<compile_context>
chip_gen: v5e
topology: v5e:2x2
jax: 0.10.0
libtpu: 0.0.40
codegen_flags: <defaults>
</compile_context>

<pallas_src>
import functools

import jax
import jax.numpy as jnp
from jax.experimental import pallas as pl
from jax.experimental.pallas import tpu as pltpu


def vq_kernel(x_ref, e_ref, e2h_ref, q_ref, sse_ref, cnt_ref, *, bf16_matmul):
    # x_ref:   (D, T)  channels-major input tile (batch dim squeezed)
    # e_ref:   (K, D)  codebook (resident across the grid)
    # e2h_ref: (K, 1)  0.5 * ||e_k||^2, f32, precomputed in the wrapper
    # q_ref:   (D, T)  quantized output tile (written back in NCHW layout)
    # sse_ref: (1, 1)  per-batch squared-error accumulator (f32)
    # cnt_ref: (K, 1)  per-batch codebook-usage accumulator (f32)
    j = pl.program_id(1)  # inner ("arbitrary") spatial-tile axis

    @pl.when(j == 0)
    def _():
        sse_ref[...] = jnp.zeros_like(sse_ref)
        cnt_ref[...] = jnp.zeros_like(cnt_ref)

    x = x_ref[...]                                   # (D, T), native dtype
    e = e_ref[...]                                   # (K, D), native dtype

    if bf16_matmul and x.dtype == jnp.float32:
        xm, em = x.astype(jnp.bfloat16), e.astype(jnp.bfloat16)
    else:
        xm, em = x, e

    # xe[k, t] = e_k . x_t : contract D on the MXU, f32 accumulation, and no
    # transposed codebook copy materialized per grid step.
    xe = jax.lax.dot_general(em, xm,
                             dimension_numbers=(((1,), (0,)), ((), ())),
                             preferred_element_type=jnp.float32)     # (K, T)

    # argmin_k ||x_t - e_k||^2 == argmin_k (0.5*||e_k||^2 - e_k.x_t)
    # (||x_t||^2 cannot change the argmin; positive scaling cannot either.)
    score = e2h_ref[...] - xe                                        # (K, T)
    min_score = jnp.min(score, axis=0, keepdims=True)                # (1, T)
    iota_k = jax.lax.broadcasted_iota(jnp.int32, score.shape, 0)     # (K, T)
    # Tie-break to the smallest index (matches torch first-hit behaviour) and
    # avoids an explicit sublane argmin: two cheap sublane min-reduces.
    idx = jnp.min(jnp.where(score == min_score, iota_k, score.shape[0]),
                  axis=0, keepdims=True)                             # (1, T)
    onehot = (iota_k == idx)                                         # (K, T)

    # q[d, t] = e[idx_t, d] : one-hot gather on the MXU (contract K). Exact
    # codebook rows regardless of matmul dtype (0/1 weights, f32 accumulate).
    q = jax.lax.dot_general(e, onehot.astype(e.dtype),
                            dimension_numbers=(((0,), (0,)), ((), ())),
                            preferred_element_type=jnp.float32)      # (D, T)
    q_ref[...] = q.astype(q_ref.dtype)

    # Exact SSE on the VPU (q holds exact codebook rows). A score-based SSE
    # would drop this subtract/square but inherits MXU rounding; it buys
    # nothing while the kernel is HBM-bound.
    diff = q - x.astype(jnp.float32)
    sse_ref[...] += jnp.sum(diff * diff, keepdims=True)              # (1, 1)
    # Counts accumulate in f32 (exact integers well past 256).
    cnt_ref[...] += jnp.sum(onehot.astype(jnp.float32), axis=1,
                            keepdims=True)                           # (K, 1)


def _vmem_capacity_bytes():
    """Generation-aware VMEM capacity (falls back to the v7x 64 MiB floor)."""
    try:
        info = pltpu.get_tpu_info()
        cap = getattr(info, "vmem_capacity_bytes", None)
        if cap:
            return int(cap)
    except Exception:
        pass
    return 64 * 1024 * 1024


def _pick_tile_hw(HW, D, K, x_itm, e_itm, budget_bytes):
    """Largest spatial tile (lane dim) fitting the VMEM budget.

    Tile must be a multiple of 128 (lane constraint) dividing HW, or HW itself.
    """
    # Per-column cost: double-buffered x & q + f32 (K,T) intermediates + q f32.
    per_col = 4 * D * x_itm + 3 * K * 4 + D * 4
    fixed = 2 * K * D * e_itm + 2 * K * 128 * 4 + (64 << 10)
    cap = max((budget_bytes - fixed) // per_col, 128)
    cap = int(min(cap, 2048))          # diminishing returns past ~2K columns
    if HW <= cap:
        return HW
    t = (min(cap, HW) // 128) * 128
    while t >= 128:
        if HW % t == 0:
            return t
        t -= 128
    # TODO(synk): mask a ragged tail instead of falling back to one full row.
    return HW


def vector_quantizer_forward(x_nchw, embeddings, commitment_cost=0.25,
                             tile_hw=None, bf16_matmul=False):
    """Forward pass of VectorQuantizer.

    Args:
        x_nchw: (B, D, H, W) inputs (PyTorch NCHW convention, D=embedding_dim).
        embeddings: (K, D) codebook (nn.Embedding weight).
    Returns:
        output_quantized (B, D, H, W), loss (scalar), perplexity (scalar).
    """
    B, D, H, W = x_nchw.shape
    K, D2 = embeddings.shape
    assert D == D2
    HW = H * W
    N = B * HW

    x_itm = x_nchw.dtype.itemsize
    e_itm = embeddings.dtype.itemsize

    vmem_cap = _vmem_capacity_bytes()
    budget = vmem_cap * 3 // 4
    if tile_hw is None:
        tile_hw = _pick_tile_hw(HW, D, K, x_itm, e_itm, budget)
    assert HW % tile_hw == 0, (HW, tile_hw)
    n_j = HW // tile_hw

    # Free, contiguous reshape: (B, D, H, W) -> (B, D, H*W). No transpose.
    x3 = x_nchw.reshape(B, D, HW)
    # Hoisted 0.5*||e_k||^2 (f32), computed once outside the grid loop.
    e2_half = 0.5 * jnp.sum(jnp.square(embeddings.astype(jnp.float32)),
                            axis=1, keepdims=True)                   # (K, 1)

    # VMEM estimate: double-buffered x & q tiles, resident codebook + e2,
    # f32 (K, T) intermediates + f32 q temp, small accumulators/slack.
    vmem_est = (4 * tile_hw * D * x_itm + 2 * K * D * e_itm
                + 2 * K * 128 * 4 + 3 * K * tile_hw * 4
                + tile_hw * D * 4 + (64 << 10))
    vmem_limit = int(min(max(vmem_est * 5 // 4, 32 << 20), budget))

    # TODO(synk): for codebooks too large to be VMEM-resident, stream K-tiles
    # with a running (min_score, argmin) carry.

    kern = functools.partial(vq_kernel, bf16_matmul=bf16_matmul)

    q3, sse, counts = pl.pallas_call(
        kern,
        out_shape=(
            jax.ShapeDtypeStruct((B, D, HW), x_nchw.dtype),
            jax.ShapeDtypeStruct((B, 1, 1), jnp.float32),
            jax.ShapeDtypeStruct((B, K, 1), jnp.float32),
        ),
        grid_spec=pltpu.PrefetchScalarGridSpec(
            num_scalar_prefetch=0,
            grid=(B, n_j),
            in_specs=[
                pl.BlockSpec((None, D, tile_hw), lambda b, j: (b, 0, j)),
                pl.BlockSpec((K, D), lambda b, j: (0, 0)),
                pl.BlockSpec((K, 1), lambda b, j: (0, 0)),
            ],
            out_specs=[
                pl.BlockSpec((None, D, tile_hw), lambda b, j: (b, 0, j)),
                pl.BlockSpec((None, 1, 1), lambda b, j: (b, 0, 0)),
                pl.BlockSpec((None, K, 1), lambda b, j: (b, 0, 0)),
            ],
        ),
        compiler_params=pltpu.CompilerParams(
            dimension_semantics=("parallel", "arbitrary"),
            vmem_limit_bytes=vmem_limit),
    )(x3, embeddings, e2_half)

    # e_latent_loss == q_latent_loss numerically (detach only affects grads).
    # TODO(synk): forward-only; reproducing the PyTorch detach()/gradient
    # split for training would need a custom VJP.
    mse = jnp.sum(sse) / (N * D)
    loss = mse + commitment_cost * mse

    avg_probs = jnp.sum(counts, axis=(0, 2)) / N
    perplexity = jnp.exp(-jnp.sum(avg_probs * jnp.log(avg_probs + 1e-10)))

    quantized = q3.reshape(B, D, H, W)    # free, contiguous split — no transpose
    # Straight-through estimator: value equals quantized, grads flow to inputs.
    output_quantized = x_nchw + jax.lax.stop_gradient(quantized - x_nchw)
    return output_quantized, loss, perplexity


def _reference(x_nchw, embeddings, commitment_cost=0.25):
    """Pure-JAX reference mirroring the PyTorch forward."""
    B, D, H, W = x_nchw.shape
    K, _ = embeddings.shape
    diff = x_nchw[:, None] - embeddings.reshape(1, K, D, 1, 1)
    distances = jnp.sum(diff ** 2, axis=2)                    # (B, K, H, W)
    idx = jnp.argmax(-distances, axis=1)                      # (B, H, W)
    quantized = jnp.transpose(embeddings[idx], (0, 3, 1, 2))  # (B, D, H, W)
    mse = jnp.mean((quantized - x_nchw) ** 2)
    loss = mse + commitment_cost * mse
    onehot = jax.nn.one_hot(idx.reshape(-1), K)
    avg_probs = jnp.mean(onehot, axis=0)
    perplexity = jnp.exp(-jnp.sum(avg_probs * jnp.log(avg_probs + 1e-10)))
    return quantized, loss, perplexity


if __name__ == "__main__":
    # Module defaults: embedding_dim=128, num_embeddings=128 (lane-dense D).
    embedding_dim = 128
    num_embeddings = 128
    B, H, W = 2, 8, 8

    key = jax.random.PRNGKey(0)
    k_x, k_w = jax.random.split(key)
    x = jax.random.normal(k_x, (B, embedding_dim, H, W), dtype=jnp.float32)
    embeddings = jax.random.normal(k_w, (num_embeddings, embedding_dim),
                                   dtype=jnp.float32)

    out_q, loss, perplexity = vector_quantizer_forward(x, embeddings)
    jax.block_until_ready((out_q, loss, perplexity))

    ref_q, ref_loss, ref_ppl = _reference(x, embeddings)
    assert jnp.allclose(out_q, ref_q, atol=1e-4, rtol=1e-4)
    assert jnp.allclose(loss, ref_loss, atol=1e-5, rtol=1e-5)
    assert jnp.allclose(perplexity, ref_ppl, atol=1e-4, rtol=1e-4)

    print("KERNEL_OK")
</pallas_src>

<mosaic_0001>
module attributes {stable_mosaic.version = 11 : i64} {
  func.func @vq_kernel(%arg0: i32, %arg1: i32, %arg2: memref<1x128x64xf32, #tpu.memory_space<vmem>>, %arg3: memref<128x128xf32, #tpu.memory_space<vmem>>, %arg4: memref<128x1xf32, #tpu.memory_space<vmem>>, %arg5: memref<1x128x64xf32, #tpu.memory_space<vmem>>, %arg6: memref<1x1x1xf32, #tpu.memory_space<vmem>>, %arg7: memref<1x128x1xf32, #tpu.memory_space<vmem>>) attributes {dimension_semantics = [#tpu.dimension_semantics<parallel>, #tpu.dimension_semantics<arbitrary>], iteration_bounds = array<i64: 2, 1>, scalar_prefetch = 0 : i64, scratch_operands = 0 : i64, tpu.core_type = #tpu.core_type<tc>, window_params = [{transform_indices = @transform_0, window_bounds = array<i64: 1, 128, 64>}, {pipeline_mode = #tpu.pipeline_mode<synchronous>, transform_indices = @transform_1, window_bounds = array<i64: 128, 128>}, {pipeline_mode = #tpu.pipeline_mode<synchronous>, transform_indices = @transform_2, window_bounds = array<i64: 128, 1>}, {transform_indices = @transform_3, window_bounds = array<i64: 1, 128, 64>}, {transform_indices = @transform_4, window_bounds = array<i64: 1, 1, 1>}, {transform_indices = @transform_5, window_bounds = array<i64: 1, 128, 1>}]} {
    %c0_i32 = arith.constant 0 : i32
    %0 = arith.cmpi eq, %arg1, %c0_i32 : i32
    %1 = arith.extui %0 : i1 to i32
    %c0_i32_0 = arith.constant 0 : i32
    %2 = arith.cmpi ne, %1, %c0_i32_0 : i32
    scf.if %2 {
      %cst_27 = arith.constant 0.000000e+00 : f32
      %50 = vector.broadcast %cst_27 : f32 to vector<1x1xf32>
      %c0_28 = arith.constant 0 : index
      %c0_29 = arith.constant 0 : index
      %c0_30 = arith.constant 0 : index
      %51 = vector.load %arg6[%c0_28, %c0_29, %c0_30] : memref<1x1x1xf32, #tpu.memory_space<vmem>>, vector<1x1x1xf32>
      %52 = vector.shape_cast %51 : vector<1x1x1xf32> to vector<1x1xf32>
      %53 = vector.shape_cast %50 : vector<1x1xf32> to vector<1x1x1xf32>
      tpu.vector_store %arg6[%c0_28, %c0_29, %c0_30], %53 {strides = array<i32>} : memref<1x1x1xf32, #tpu.memory_space<vmem>>, vector<1x1x1xf32>,
      %cst_31 = arith.constant 0.000000e+00 : f32
      %54 = vector.broadcast %cst_31 : f32 to vector<128x1xf32>
      %c0_32 = arith.constant 0 : index
      %c0_33 = arith.constant 0 : index
      %c0_34 = arith.constant 0 : index
      %55 = vector.load %arg7[%c0_32, %c0_33, %c0_34] : memref<1x128x1xf32, #tpu.memory_space<vmem>>, vector<1x128x1xf32>
      %56 = vector.shape_cast %55 : vector<1x128x1xf32> to vector<128x1xf32>
      %57 = vector.shape_cast %54 : vector<128x1xf32> to vector<1x128x1xf32>
      tpu.vector_store %arg7[%c0_32, %c0_33, %c0_34], %57 {strides = array<i32>} : memref<1x128x1xf32, #tpu.memory_space<vmem>>, vector<1x128x1xf32>,
    } else {
    }
    %c0 = arith.constant 0 : index
    %c0_1 = arith.constant 0 : index
    %c0_2 = arith.constant 0 : index
    %3 = vector.load %arg2[%c0, %c0_1, %c0_2] : memref<1x128x64xf32, #tpu.memory_space<vmem>>, vector<1x128x64xf32>
    %4 = vector.shape_cast %3 : vector<1x128x64xf32> to vector<128x64xf32>
    %c0_3 = arith.constant 0 : index
    %c0_4 = arith.constant 0 : index
    %5 = vector.load %arg3[%c0_3, %c0_4] : memref<128x128xf32, #tpu.memory_space<vmem>>, vector<128x128xf32>
    %cst = arith.constant dense<0.000000e+00> : vector<128x64xf32>
    %6 = tpu.matmul %5, %4, %cst {dimension_numbers = #tpu.dot_dimension_numbers<[1], [0], [0], [1], [0, 0, 1, 1], [], []>} : vector<128x128xf32>, vector<128x64xf32>, vector<128x64xf32> -> vector<128x64xf32>
    %c0_5 = arith.constant 0 : index
    %c0_6 = arith.constant 0 : index
    %7 = vector.load %arg4[%c0_5, %c0_6] : memref<128x1xf32, #tpu.memory_space<vmem>>, vector<128x1xf32>
    %8 = vector.broadcast %7 : vector<128x1xf32> to vector<128x64xf32>
    %9 = arith.subf %8, %6 : vector<128x64xf32>
    %cst_7 = arith.constant dense<0x7F800000> : vector<64xf32>
    %10 = vector.multi_reduction <minimumf>, %9, %cst_7 [0] : vector<128x64xf32> to vector<64xf32>
    %11 = vector.shape_cast %10 : vector<64xf32> to vector<1x64xf32>
    %12 = tpu.iota {dimensions = array<i32: 0>} : vector<128x64xi32>
    %13 = vector.broadcast %11 : vector<1x64xf32> to vector<128x64xf32>
    %14 = arith.cmpf oeq, %9, %13 : vector<128x64xf32>
    %c128_i32 = arith.constant 128 : i32
    %15 = vector.broadcast %c128_i32 : i32 to vector<128x64xi32>
    %16 = arith.select %14, %12, %15 : vector<128x64xi1>, vector<128x64xi32>
    %cst_8 = arith.constant dense<2147483647> : vector<64xi32>
    %17 = vector.multi_reduction <minsi>, %16, %cst_8 [0] : vector<128x64xi32> to vector<64xi32>
    %18 = vector.shape_cast %17 : vector<64xi32> to vector<1x64xi32>
    %19 = vector.broadcast %18 : vector<1x64xi32> to vector<128x64xi32>
    %20 = arith.cmpi eq, %12, %19 : vector<128x64xi32>
    %21 = arith.extui %20 : vector<128x64xi1> to vector<128x64xi32>
    %22 = arith.sitofp %21 : vector<128x64xi32> to vector<128x64xf32>
    %cst_9 = arith.constant dense<0.000000e+00> : vector<128x64xf32>
    %23 = tpu.matmul %5, %22, %cst_9 {dimension_numbers = #tpu.dot_dimension_numbers<[0], [0], [1], [1], [0, 1, 1, 1], [], []>} : vector<128x128xf32>, vector<128x64xf32>, vector<128x64xf32> -> vector<128x64xf32>
    %c0_10 = arith.constant 0 : index
    %c0_11 = arith.constant 0 : index
    %c0_12 = arith.constant 0 : index
    %24 = vector.load %arg5[%c0_10, %c0_11, %c0_12] : memref<1x128x64xf32, #tpu.memory_space<vmem>>, vector<1x128x64xf32>
    %25 = vector.shape_cast %24 : vector<1x128x64xf32> to vector<128x64xf32>
    %26 = vector.shape_cast %23 : vector<128x64xf32> to vector<1x128x64xf32>
    tpu.vector_store %arg5[%c0_10, %c0_11, %c0_12], %26 {strides = array<i32>} : memref<1x128x64xf32, #tpu.memory_space<vmem>>, vector<1x128x64xf32>,
    %27 = arith.subf %23, %4 : vector<128x64xf32>
    %c0_13 = arith.constant 0 : index
    %c0_14 = arith.constant 0 : index
    %c0_15 = arith.constant 0 : index
    %28 = vector.load %arg6[%c0_13, %c0_14, %c0_15] : memref<1x1x1xf32, #tpu.memory_space<vmem>>, vector<1x1x1xf32>
    %29 = vector.shape_cast %28 : vector<1x1x1xf32> to vector<1x1xf32>
    %30 = arith.mulf %27, %27 : vector<128x64xf32>
    %31 = vector.shape_cast %30 : vector<128x64xf32> to vector<1x128x64xf32>
    %cst_16 = arith.constant dense<0.000000e+00> : vector<1xf32>
    %32 = vector.multi_reduction <add>, %31, %cst_16 [1, 2] : vector<1x128x64xf32> to vector<1xf32>
    %33 = vector.shape_cast %32 : vector<1xf32> to vector<1x1x1xf32>
    %34 = vector.extract %33[0, 0, 0] : f32 from vector<1x1x1xf32>
    %35 = vector.broadcast %34 : f32 to vector<1x1xf32>
    %36 = arith.addf %29, %35 : vector<1x1xf32>
    %c0_17 = arith.constant 0 : index
    %c0_18 = arith.constant 0 : index
    %c0_19 = arith.constant 0 : index
    %37 = vector.load %arg6[%c0_17, %c0_18, %c0_19] : memref<1x1x1xf32, #tpu.memory_space<vmem>>, vector<1x1x1xf32>
    %38 = vector.shape_cast %37 : vector<1x1x1xf32> to vector<1x1xf32>
    %39 = vector.shape_cast %36 : vector<1x1xf32> to vector<1x1x1xf32>
    tpu.vector_store %arg6[%c0_17, %c0_18, %c0_19], %39 {strides = array<i32>} : memref<1x1x1xf32, #tpu.memory_space<vmem>>, vector<1x1x1xf32>,
    %c0_20 = arith.constant 0 : index
    %c0_21 = arith.constant 0 : index
    %c0_22 = arith.constant 0 : index
    %40 = vector.load %arg7[%c0_20, %c0_21, %c0_22] : memref<1x128x1xf32, #tpu.memory_space<vmem>>, vector<1x128x1xf32>
    %41 = vector.shape_cast %40 : vector<1x128x1xf32> to vector<128x1xf32>
    %42 = arith.extui %20 : vector<128x64xi1> to vector<128x64xi32>
    %43 = arith.sitofp %42 : vector<128x64xi32> to vector<128x64xf32>
    %cst_23 = arith.constant dense<0.000000e+00> : vector<128xf32>
    %44 = vector.multi_reduction <add>, %43, %cst_23 [1] : vector<128x64xf32> to vector<128xf32>
    %45 = vector.shape_cast %44 : vector<128xf32> to vector<128x1xf32>
    %46 = arith.addf %41, %45 : vector<128x1xf32>
    %c0_24 = arith.constant 0 : index
    %c0_25 = arith.constant 0 : index
    %c0_26 = arith.constant 0 : index
    %47 = vector.load %arg7[%c0_24, %c0_25, %c0_26] : memref<1x128x1xf32, #tpu.memory_space<vmem>>, vector<1x128x1xf32>
    %48 = vector.shape_cast %47 : vector<1x128x1xf32> to vector<128x1xf32>
    %49 = vector.shape_cast %46 : vector<128x1xf32> to vector<1x128x1xf32>
    tpu.vector_store %arg7[%c0_24, %c0_25, %c0_26], %49 {strides = array<i32>} : memref<1x128x1xf32, #tpu.memory_space<vmem>>, vector<1x128x1xf32>,
    return
  }
  func.func @transform_0(%arg0: i32, %arg1: i32) -> (i32, i32, i32) {
    %c0_i32 = arith.constant 0 : i32
    %c0_i32_0 = arith.constant 0 : i32
    return %arg0, %c0_i32, %arg1 : i32, i32, i32
  }
  func.func @transform_1(%arg0: i32, %arg1: i32) -> (i32, i32) {
    %c0_i32 = arith.constant 0 : i32
    %c0_i32_0 = arith.constant 0 : i32
    %c0_i32_1 = arith.constant 0 : i32
    return %c0_i32, %c0_i32_0 : i32, i32
  }
  func.func @transform_2(%arg0: i32, %arg1: i32) -> (i32, i32) {
    %c0_i32 = arith.constant 0 : i32
    %c0_i32_0 = arith.constant 0 : i32
    %c0_i32_1 = arith.constant 0 : i32
    return %c0_i32, %c0_i32_0 : i32, i32
  }
  func.func @transform_3(%arg0: i32, %arg1: i32) -> (i32, i32, i32) {
    %c0_i32 = arith.constant 0 : i32
    %c0_i32_0 = arith.constant 0 : i32
    return %arg0, %c0_i32, %arg1 : i32, i32, i32
  }
  func.func @transform_4(%arg0: i32, %arg1: i32) -> (i32, i32, i32) {
    %c0_i32 = arith.constant 0 : i32
    %c0_i32_0 = arith.constant 0 : i32
    %c0_i32_1 = arith.constant 0 : i32
    return %arg0, %c0_i32, %c0_i32_0 : i32, i32, i32
  }
  func.func @transform_5(%arg0: i32, %arg1: i32) -> (i32, i32, i32) {
    %c0_i32 = arith.constant 0 : i32
    %c0_i32_0 = arith.constant 0 : i32
    %c0_i32_1 = arith.constant 0 : i32
    return %arg0, %c0_i32, %c0_i32_0 : i32, i32, i32
  }
}

</mosaic_0001>

<bundles_post_ra>
// kernel: tpu_custom_call.1
= control target key start
LH: loop header
LB: loop body
LE: loop exit
PB: predicated region body
PF: predicated region fallthrough
CT: control target
= control target key end

     0   :  { %s1302_s18 = smov 0   ;;  %s1304_s19 = smov 0   ;;  %s2107_s0 = inlined_call_operand.vmem [shape: f32[2,128,64], index: 0, kind: input, shape index: {}]   ;;  %s2108_s1 = inlined_call_operand.vmem [shape: f32[128,128], index: 1, kind: input, shape index: {}]   ;;  %s2109_s2 = inlined_call_operand.vmem [shape: f32[128,1], index: 2, kind: input, shape index: {}]   ;;  %s2110_s3 = inlined_call_operand.vmem [shape: f32[2,128,64], index: 3, kind: output, shape index: {0}]   ;;  %s2111_s4 = inlined_call_operand.vmem [shape: f32[2,1,1], index: 4, kind: output, shape index: {1}]   ;;  %s2112_s5 = inlined_call_operand.vmem [shape: f32[2,128,1], index: 5, kind: output, shape index: {2}]  }
   0x1   :  { %s1306_s20 = smov 0  }
   0x2 LB: > { %s28_s21 = sadd.s32 1, %s1263_s19  ;;  %p1131_p0 = scmp.ge.s32.totalorder %s1267_s20, 1  ;;  %s1267_s20 = sphi %s1306_s20, %s16_s20   ;;  %s1263_s19 = sphi %s1304_s19, %s2172_s19   ;;  %s1259_s18 = sphi %s1302_s18, %s2171_s18  }
   0x3   : > { %p30_p1 = scmp.ge.s32.totalorder %s28_s21, 2  ;;  %p211_p2 = scmp.lt.s32.totalorder %s1267_s20, 3 }
   0x5   : > { %s2174_s21 = smov (%p30_p1, %s28_s21), 0  ;;  %p212_p3 = pnand %p1131_p0, %p211_p2 }
   0x6   : > { %p253_p4 = scmp.lt.s32.totalorder (!%p212_p3), %s1259_s18, 1 }
   0x7   : > { %215 = sbr.rel (%p212_p3) target bundleno = 719 (0x2cf), region = 32 }
   0xc   : > { %v399_v0 = vld [vmem:[%s2109_s2 + $0x10] sm:$0xff]  ;;  %v1269_v1 = vmov 0   ;;  %v397_v2 = vld [vmem:[%s2109_s2] sm:$0xff]  ;;  %s2176_s18 = smov (!%p253_p4, %s1259_s18), 1  ;;  %v400_v5 = vld [vmem:[%s2109_s2 + $0x18] sm:$0xff]  ;;  %vm2113_vm0 = vcmask 523264  }
   0xd   : > { %1237 = vset.pattern.permute.xlu1 %v1269_v1  ;;  %1236 = vset.pattern.permute.xlu0 %v1269_v1  ;;  %s1329_s26 = sshll.u32 %s2176_s18, 7  ;;  %v398_v8 = vld [vmem:[%s2109_s2 + $0x8] sm:$0xff]  ;;  %v404_v11 = vld [vmem:[%s2109_s2 + $0x38] sm:$0xff]  ;;  %v403_v13 = vld [vmem:[%s2109_s2 + $0x30] sm:$0xff]  ;;  %s271_s14 = scalar_lea.vmem %s2111_s4, %s2176_s18 }
   0xe   : > { %425 = vperm.xlu1 %1237, %v399_v0   ;;  %415 = vperm.xlu0 %1236, %v397_v2   ;;  %s1335_s29 = scalar_lea.vmem %s2107_s0, %s1329_s26  ;;  %v407_v17 = vld [vmem:[%s2109_s2 + $0x50] sm:$0xff]  ;;  %v406_v19 = vld [vmem:[%s2109_s2 + $0x48] sm:$0xff]  ;;  %v401_v23 = vld [vmem:[%s2109_s2 + $0x20] sm:$0xff]  ;;  %s1874_s10 = scalar_lea.vmem %s2112_s5, %s1329_s26 }
   0xf   : > { %1238 = vset.pattern.permute.xlu2 %v1269_v1  ;;  %v315_v3 = vld [vmem:[%s1335_s29 + $0x78] sm:$0xff]  ;;  %v314_v4 = vld [vmem:[%s1335_s29 + $0x70] sm:$0xff]  ;;  %v313_v6 = vld [vmem:[%s1335_s29 + $0x68] sm:$0xff]  ;;  %s1952_s13 = scalar_lea.vmem %s2110_s3, %s1329_s26 }
  0x10   : > { %332 = vmatpush.msra.mxu0 %v315_v3  ;;  %1175 = vmatpush.msra.mxu2 %v315_v3  ;;  %v312_v7 = vld [vmem:[%s1335_s29 + $0x60] sm:$0xff]  ;;  %v311_v9 = vld [vmem:[%s1335_s29 + $0x58] sm:$0xff]  ;;  %v310_v10 = vld [vmem:[%s1335_s29 + $0x50] sm:$0xff] }
  0x11   : > { %v1353_v12 = vld [vmem:[%s1335_s29 + $0x48] sm:$0xff]  ;;  %v1359_v14 = vld [vmem:[%s1335_s29 + $0x40] sm:$0xff]  ;;  %v1364_v15 = vld [vmem:[%s1335_s29 + $0x38] sm:$0xff]  ;;  %435 = vperm.xlu2 %1238, %v401_v23  }
  0x12   : > { %333 = vmatpush.msra.mxu0 %v314_v4  ;;  %1176 = vmatpush.msra.mxu2 %v314_v4  ;;  %v1369_v16 = vld [vmem:[%s1335_s29 + $0x30] sm:$0xff]  ;;  %v1377_v18 = vld [vmem:[%s1335_s29 + $0x28] sm:$0xff]  ;;  %v1385_v20 = vld [vmem:[%s1335_s29 + $0x20] sm:$0xff] }
  0x13   : > { %v1390_v21 = vld [vmem:[%s1335_s29 + $0x18] sm:$0xff]  ;;  %v1395_v22 = vld [vmem:[%s1335_s29 + $0x10] sm:$0xff]  ;;  %v410_v24 = vld [vmem:[%s2109_s2 + $0x68] sm:$0xff] }
  0x14   : > { %334 = vmatpush.msra.mxu0 %v313_v6  ;;  %1177 = vmatpush.msra.mxu2 %v313_v6  ;;  %v1406_v25 = vld [vmem:[%s1335_s29 + $0x8] sm:$0xff]  ;;  %v409_v26 = vld [vmem:[%s2109_s2 + $0x60] sm:$0xff]  ;;  %v412_v31 = vld [vmem:[%s2109_s2 + $0x78] sm:$0xff] }
  0x15   : > { %v1414_v27 = vld [vmem:[%s1335_s29] sm:$0xff]  ;;  %v402_v30 = vld [vmem:[%s2109_s2 + $0x28] sm:$0xff]  ;;  %v318_v35 = vld [vmem:[%s2108_s1 + $0x10] sm:$0xff] }
  0x16   : > { %430 = vperm.xlu1 %1237, %v400_v5   ;;  %420 = vperm.xlu0 %1236, %v398_v8   ;;  %v316_v28 = vld [vmem:[%s2108_s1] sm:$0xff]  ;;  %v317_v32 = vld [vmem:[%s2108_s1 + $0x8] sm:$0xff]  ;;  %v326_v36 = vld [vmem:[%s2108_s1 + $0x50] sm:$0xff] }
  0x17   : > { %335 = vmatpush.msra.mxu0 %v312_v7  ;;  %1178 = vmatpush.msra.mxu2 %v312_v7  ;;  %v324_v29 = vld [vmem:[%s2108_s1 + $0x40] sm:$0xff]  ;;  %v325_v33 = vld [vmem:[%s2108_s1 + $0x48] sm:$0xff]  ;;  %v319_v37 = vld [vmem:[%s2108_s1 + $0x18] sm:$0xff] }
  0x18   : > { %v405_v34 = vld [vmem:[%s2109_s2 + $0x40] sm:$0xff]  ;;  %v327_v38 = vld [vmem:[%s2108_s1 + $0x58] sm:$0xff]  ;;  %v411_v42 = vld [vmem:[%s2109_s2 + $0x70] sm:$0xff] }
  0x19   : > { %336 = vmatpush.msra.mxu0 %v311_v9  ;;  %1179 = vmatpush.msra.mxu2 %v311_v9  ;;  %v408_v39 = vld [vmem:[%s2109_s2 + $0x58] sm:$0xff]  ;;  %v320_v40 = vld [vmem:[%s2108_s1 + $0x20] sm:$0xff]  ;;  %v321_v43 = vld [vmem:[%s2108_s1 + $0x28] sm:$0xff] }
  0x1a   : > { %440 = vperm.xlu2 %1238, %v402_v30   ;;  %v328_v41 = vld [vmem:[%s2108_s1 + $0x60] sm:$0xff]  ;;  %v329_v44 = vld [vmem:[%s2108_s1 + $0x68] sm:$0xff]  ;;  %v322_v45 = vld [vmem:[%s2108_s1 + $0x30] sm:$0xff] }
  0x1b   : > { %337 = vmatpush.msra.mxu0 %v310_v10  ;;  %1180 = vmatpush.msra.mxu2 %v310_v10  ;;  %v330_v46 = vld [vmem:[%s2108_s1 + $0x70] sm:$0xff]  ;;  %v323_v47 = vld [vmem:[%s2108_s1 + $0x38] sm:$0xff] }
  0x1c   : > { %v331_v48 = vld [vmem:[%s2108_s1 + $0x78] sm:$0xff] }
  0x1d   : > { %338 = vmatpush.msra.mxu0 %v1353_v12  ;;  %1181 = vmatpush.msra.mxu2 %v1353_v12 }
  0x1e   : > { %450 = vperm.xlu1 %1237, %v404_v11   ;;  %445 = vperm.xlu0 %1236, %v403_v13  }
  0x1f   : > { %339 = vmatpush.msra.mxu0 %v1359_v14  ;;  %1182 = vmatpush.msra.mxu2 %v1359_v14 }
  0x21   : > { %340 = vmatpush.msra.mxu0 %v1364_v15  ;;  %1183 = vmatpush.msra.mxu2 %v1364_v15 }
  0x22   : > { %455 = vperm.xlu2 %1238, %v405_v34  }
  0x23   : > { %341 = vmatpush.msra.mxu0 %v1369_v16  ;;  %1184 = vmatpush.msra.mxu2 %v1369_v16 }
  0x25   : > { %342 = vmatpush.msra.mxu0 %v1377_v18  ;;  %1185 = vmatpush.msra.mxu2 %v1377_v18 }
  0x26   : > { %465 = vperm.xlu1 %1237, %v407_v17   ;;  %460 = vperm.xlu0 %1236, %v406_v19  }
  0x27   : > { %343 = vmatpush.msra.mxu0 %v1385_v20  ;;  %1186 = vmatpush.msra.mxu2 %v1385_v20 }
  0x29   : > { %344 = vmatpush.msra.mxu0 %v1390_v21  ;;  %1187 = vmatpush.msra.mxu2 %v1390_v21 }
  0x2a   : > { %470 = vperm.xlu2 %1238, %v408_v39  }
  0x2b   : > { %345 = vmatpush.msra.mxu0 %v1395_v22  ;;  %1188 = vmatpush.msra.mxu2 %v1395_v22 }
  0x2d   : > { %346 = vmatpush.msra.mxu0 %v1406_v25  ;;  %1189 = vmatpush.msra.mxu2 %v1406_v25 }
  0x2e   : > { %480 = vperm.xlu1 %1237, %v410_v24   ;;  %475 = vperm.xlu0 %1236, %v409_v26  }
  0x2f   : > { %347 = vmatpush.msra.mxu0 %v1414_v27  ;;  %1190 = vmatpush.msra.mxu2 %v1414_v27 }
  0x30   : > { %348 = vmatmul.f32.vlgmr.msra.gmra.mxu0 %v316_v28  ;;  %372 = vmatmul.f32.vlgmr.msra.gmra.mxu2 %v324_v29 }
  0x32   : > { %485 = vperm.xlu2 %1238, %v411_v42  }
  0x36   : > { %490 = vperm.xlu0 %1236, %v412_v31  }
  0x38   : > { %351 = vmatmul.f32.gmra.mxu0 %v317_v32  ;;  %375 = vmatmul.f32.gmra.mxu2 %v325_v33 }
  0x40   : > { %354 = vmatmul.f32.gmra.mxu0 %v318_v35  ;;  %378 = vmatmul.f32.gmra.mxu2 %v326_v36 }
  0x48   : > { %357 = vmatmul.f32.gmra.mxu0 %v319_v37  ;;  %381 = vmatmul.f32.gmra.mxu2 %v327_v38 }
  0x50   : > { %360 = vmatmul.f32.gmra.mxu0 %v320_v40  ;;  %384 = vmatmul.f32.gmra.mxu2 %v328_v41 }
  0x58   : > { %363 = vmatmul.f32.gmra.mxu0 %v321_v43  ;;  %387 = vmatmul.f32.gmra.mxu2 %v329_v44 }
  0x60   : > { %366 = vmatmul.f32.gmra.mxu0 %v322_v45  ;;  %390 = vmatmul.f32.gmra.mxu2 %v330_v46 }
  0x63   : > { %699 = vxpose.xlu1.b32.start [1/16] %v316_v28, 128 }
  0x68   : > { %369 = vmatmul.f32.gmra.mxu0 %v323_v47  ;;  %393 = vmatmul.f32.gmra.mxu2 %v331_v48 }
  0x6b   : > { %700 = vxpose.xlu1.b32.cont [2/16] %v317_v32, 128  ;;  %v436_v56 = vpop.permute.xlu2 %435 }
  0x73   : > { %701 = vxpose.xlu1.b32.cont [3/16] %v318_v35, 128 }
  0x74   : > { %v441_v61 = vpop.permute.xlu2 %440 }
  0x7b   : > { %702 = vxpose.xlu1.b32.cont [4/16] %v319_v37, 128 }
  0x7c   : > { %v456_v3 = vpop.permute.xlu2 %455 }
  0x80   : > { %v416_v52 = vpop.permute.xlu0 %415  ;;  %v426_v54 = vpop.permute.xlu1 %425 }
  0x83   : > { %703 = vxpose.xlu1.b32.cont [5/16] %v320_v40, 128 }
  0x84   : > { %v471_v8 = vpop.permute.xlu2 %470 }
  0x88   : > { %v421_v57 = vpop.permute.xlu0 %420  ;;  %v431_v60 = vpop.permute.xlu1 %430 }
  0x8b   : > { %704 = vxpose.xlu1.b32.cont [6/16] %v321_v43, 128 }
  0x8c   : > { %v486_v43 = vpop.permute.xlu2 %485 }
  0x90   : > { %v446_v63 = vpop.permute.xlu0 %445  ;;  %v451_v1 = vpop.permute.xlu1 %450 }
  0x93   : > { %705 = vxpose.xlu1.b32.cont [7/16] %v322_v45, 128 }
  0x98   : > { %v461_v5 = vpop.permute.xlu0 %460  ;;  %v466_v6 = vpop.permute.xlu1 %465 }
  0x9b   : > { %706 = vxpose.xlu1.b32.cont [8/16] %v323_v47, 128 }
  0xa0   : > { %v476_v17 = vpop.permute.xlu0 %475  ;;  %v481_v30 = vpop.permute.xlu1 %480 }
  0xa3   : > { %707 = vxpose.xlu1.b32.cont [9/16] %v324_v29, 128 }
  0xab   : > { %708 = vxpose.xlu1.b32.cont [10/16] %v325_v33, 128 }
  0xad   : > { %v349_v49 = vpop.f32.mrf.mxu0 }
  0xae   : > { %v1485_v11 = vsub.f32 %v416_v52, %v349_v49 }
  0xb0   : > { %v510_v31 = vsel %vm2113_vm0, %v1485_v11, inf }
  0xb3   : > { %709 = vxpose.xlu1.b32.cont [11/16] %v326_v36, 128  ;;  %v373_v50 = vpop.f32.mrf.mxu2 }
  0xb4   : > { %v1501_v32 = vsub.f32 %v456_v3, %v373_v50 }
  0xb5   : > { %v352_v51 = vpop.f32.mrf.mxu0 }
  0xb6   : > { %v1487_v13 = vsub.f32 %v421_v57, %v352_v51 }
  0xb8   : > { %v511_v33 = vsel %vm2113_vm0, %v1487_v13, inf }
  0xbb   : > { %710 = vxpose.xlu1.b32.cont [12/16] %v327_v38, 128  ;;  %v376_v53 = vpop.f32.mrf.mxu2 }
  0xbc   : > { %v1505_v34 = vsub.f32 %v461_v5, %v376_v53 }
  0xbd   : > { %v355_v55 = vpop.f32.mrf.mxu0 }
  0xbe   : > { %v1493_v24 = vsub.f32 %v426_v54, %v355_v55  ;;  %v524_v52 = vsel %vm2113_vm0, %v1505_v34, inf  ;;  %v522_v54 = vsel %vm2113_vm0, %v1501_v32, inf }
  0xc0   : > { %v512_v40 = vsel %vm2113_vm0, %v1493_v24, inf }
  0xc3   : > { %711 = vxpose.xlu1.b32.cont [13/16] %v328_v41, 128  ;;  %v379_v58 = vpop.f32.mrf.mxu2 }
  0xc4   : > { %v1517_v41 = vsub.f32 %v466_v6, %v379_v58 }
  0xc5   : > { %v358_v59 = vpop.f32.mrf.mxu0 }
  0xc6   : > { %v1495_v26 = vsub.f32 %v431_v60, %v358_v59  ;;  %v526_v55 = vsel %vm2113_vm0, %v1517_v41, inf }
  0xc8   : > { %v513_v42 = vsel %vm2113_vm0, %v1495_v26, inf }
  0xcb   : > { %712 = vxpose.xlu1.b32.cont [14/16] %v329_v44, 128  ;;  %v382_v62 = vpop.f32.mrf.mxu2 }
  0xcc   : > { %v1521_v45 = vsub.f32 %v471_v8, %v382_v62 }
  0xcd   : > { %v361_v0 = vpop.f32.mrf.mxu0 }
  0xce   : > { %v1489_v19 = vsub.f32 %v436_v56, %v361_v0  ;;  %v491_v56 = vpop.permute.xlu0 %490  ;;  %v528_v59 = vsel %vm2113_vm0, %v1521_v45, inf }
  0xd0   : > { %v514_v36 = vsel %vm2113_vm0, %v1489_v19, inf }
  0xd1   : > { %v515_v49 = vmin.f32 %v510_v31, %v514_v36 }
  0xd3   : > { %713 = vxpose.xlu1.b32.cont [15/16] %v330_v46, 128  ;;  %v385_v2 = vpop.f32.mrf.mxu2 }
  0xd4   : > { %v1523_v46 = vsub.f32 %v476_v17, %v385_v2  ;;  %v547_v17 = vlaneseq }
  0xd5   : > { %v364_v4 = vpop.f32.mrf.mxu0 }
  0xd6   : > { %v1483_v10 = vsub.f32 %v441_v61, %v364_v4  ;;  %v530_v60 = vsel %vm2113_vm0, %v1523_v46, inf }
  0xd8   : > { %v516_v29 = vsel %vm2113_vm0, %v1483_v10, inf }
  0xd9   : > { %v517_v44 = vmin.f32 %v511_v33, %v516_v29 }
  0xdb   : > { %714 = vxpose.xlu1.b32.end [16/16] %v331_v48, 128  ;;  %v388_v7 = vpop.f32.mrf.mxu2  ;;  %v525_v57 = vmin.f32 %v517_v44, %v524_v52 }
  0xdc   : > { %v1509_v37 = vsub.f32 %v481_v30, %v388_v7  ;;  %v1547_v30 = vshrl.u32 %v547_v17, 7 }
  0xdd   : > { %v367_v9 = vpop.f32.mrf.mxu0 }
  0xde   : > { %v1491_v23 = vsub.f32 %v446_v63, %v367_v9  ;;  %v532_v53 = vsel %vm2113_vm0, %v1509_v37, inf  ;;  %v523_v63 = vmin.f32 %v515_v49, %v522_v54  ;;  %v1565_v44 = vadd.s32 48, %v1547_v30 }
  0xdf   : > { %v533_v0 = vmin.f32 %v525_v57, %v532_v53  ;;  %v1571_v49 = vadd.s32 64, %v1547_v30  ;;  %v1577_v52 = vadd.s32 80, %v1547_v30  ;;  %v1580_v53 = vadd.s32 88, %v1547_v30 }
  0xe0   : > { %v518_v38 = vsel %vm2113_vm0, %v1491_v23, inf  ;;  %v531_v4 = vmin.f32 %v523_v63, %v530_v60  ;;  %v1583_v54 = vadd.s32 96, %v1547_v30  ;;  %v1592_v57 = vadd.s32 120, %v1547_v30 }
  0xe1   : > { %v519_v50 = vmin.f32 %v512_v40, %v518_v38  ;;  %v1553_v38 = vadd.s32 16, %v1547_v30  ;;  %v1556_v40 = vadd.s32 24, %v1547_v30 }
  0xe2   : > { %v538_v7 = vmin.f32 %v531_v4, %v533_v0 }
  0xe3   : > { %v391_v28 = vpop.f32.mrf.mxu2 }
  0xe4   : > { %v1525_v47 = vsub.f32 %v486_v43, %v391_v28  ;;  %v1562_v43 = vadd.s32 40, %v1547_v30 }
  0xe5   : > { %v370_v35 = vpop.f32.mrf.mxu0 }
  0xe6   : > { %v1513_v39 = vsub.f32 %v451_v1, %v370_v35  ;;  %v534_v61 = vsel %vm2113_vm0, %v1525_v47, inf  ;;  %v527_v1 = vmin.f32 %v519_v50, %v526_v55  ;;  %v1550_v35 = vadd.s32 8, %v1547_v30 }
  0xe7   : > { %v1586_v55 = vadd.s32 104, %v1547_v30 }
  0xe8   : > { %v520_v48 = vsel %vm2113_vm0, %v1513_v39, inf  ;;  %v535_v5 = vmin.f32 %v527_v1, %v534_v61 }
  0xe9   : > { %v521_v51 = vmin.f32 %v513_v42, %v520_v48  ;;  %v1559_v42 = vadd.s32 32, %v1547_v30  ;;  %v1568_v48 = vadd.s32 56, %v1547_v30 }
  0xeb   : > { %v394_v58 = vpop.f32.mrf.mxu2  ;;  %v529_v2 = vmin.f32 %v521_v51, %v528_v59  ;;  %v1574_v51 = vadd.s32 72, %v1547_v30 }
  0xec   : > { %v1543_v62 = vsub.f32 %v491_v56, %v394_v58  ;;  %v1589_v56 = vadd.s32 112, %v1547_v30 }
  0xee   : > { %v536_v3 = vsel %vm2113_vm0, %v1543_v62, inf }
  0xef   : > { %v537_v6 = vmin.f32 %v529_v2, %v536_v3 }
  0xf1   : > { %v539_v8 = vmin.f32 %v535_v5, %v537_v6 }
  0xf3   : > { %v540_v9 = vmin.f32 %v538_v7, %v539_v8 }
  0xf5   : > { %v541_v28 = vrot.slane %v540_v9, 4 }
  0xf7   : > { %v542_v29 = vmin.f32 %v540_v9, %v541_v28 }
  0xf9   : > { %v543_v31 = vrot.slane %v542_v29, 2 }
  0xfb   : > { %v544_v33 = vmin.f32 %v542_v29, %v543_v31 }
  0xfd   : > { %v545_v36 = vrot.slane %v544_v33, 1 }
  0xff   : > { %v546_v50 = vmin.f32 %v544_v33, %v545_v36 }
 0x101   : > { %vm564_vm1 = vcmp.eq.f32.partialorder %v1485_v11, %v546_v50  ;;  %vm565_vm2 = vcmp.eq.f32.partialorder %v1487_v13, %v546_v50  ;;  %vm566_vm3 = vcmp.eq.f32.partialorder %v1493_v24, %v546_v50  ;;  %vm567_vm4 = vcmp.eq.f32.partialorder %v1495_v26, %v546_v50 }
 0x102   : > { %vm568_vm5 = vcmp.eq.f32.partialorder %v1489_v19, %v546_v50  ;;  %vm569_vm6 = vcmp.eq.f32.partialorder %v1483_v10, %v546_v50  ;;  %vm570_vm7 = vcmp.eq.f32.partialorder %v1491_v23, %v546_v50  ;;  %vm571_vm8 = vcmp.eq.f32.partialorder %v1513_v39, %v546_v50 }
 0x103   : > { %vm572_vm9 = vcmp.eq.f32.partialorder %v1501_v32, %v546_v50  ;;  %vm573_vm10 = vcmp.eq.f32.partialorder %v1505_v34, %v546_v50  ;;  %vm574_vm11 = vcmp.eq.f32.partialorder %v1517_v41, %v546_v50  ;;  %vm575_vm12 = vcmp.eq.f32.partialorder %v1521_v45, %v546_v50 }
 0x104   : > { %vm576_vm13 = vcmp.eq.f32.partialorder %v1523_v46, %v546_v50  ;;  %vm577_vm14 = vcmp.eq.f32.partialorder %v1509_v37, %v546_v50  ;;  %vm578_vm15 = vcmp.eq.f32.partialorder %v1525_v47, %v546_v50  ;;  %vm579_vm0 = vcmp.eq.f32.partialorder %v1543_v62, %v546_v50 }
 0x105   : > { %v580_v58 = vsel %vm564_vm1, %v1547_v30, 128  ;;  %v581_v59 = vsel %vm565_vm2, %v1550_v35, 128  ;;  %v582_v60 = vsel %vm566_vm3, %v1553_v38, 128  ;;  %v583_v61 = vsel %vm567_vm4, %v1556_v40, 128 }
 0x106   : > { %v584_v0 = vsel %vm568_vm5, %v1559_v42, 128  ;;  %v585_v11 = vsel %vm569_vm6, %v1562_v43, 128  ;;  %v586_v13 = vsel %vm570_vm7, %v1565_v44, 128  ;;  %v587_v24 = vsel %vm571_vm8, %v1568_v48, 128 }
 0x107   : > { %v1622_v63 = vpop.trf.xlu1  ;;  %v588_v26 = vsel %vm572_vm9, %v1571_v49, 128  ;;  %v589_v19 = vsel %vm573_vm10, %v1574_v51, 128  ;;  %v590_v10 = vsel %vm574_vm11, %v1577_v52, 128  ;;  %v591_v23 = vsel %vm575_vm12, %v1580_v53, 128 }
 0x108   : > { %v592_v39 = vsel %vm576_vm13, %v1583_v54, 128  ;;  %v593_v32 = vsel %vm577_vm14, %v1586_v55, 128  ;;  %v594_v34 = vsel %vm578_vm15, %v1589_v56, 128  ;;  %v595_v41 = vsel %vm579_vm0, %v1592_v57, 128 }
 0x109   : > { %vm2114_vm1 = vcmask 523264  }
 0x10a   : > { %v596_v1 = vsel %vm2114_vm1, %v580_v58, 2147483647  ;;  %vm2115_vm2 = vmmov %vm2114_vm1  ;;  %v618_v28 = vsel %vm2114_vm1, %v590_v10, 2147483647 }
 0x10b   : > { %v597_v45 = vsel %vm2115_vm2, %v581_v59, 2147483647  ;;  %vm2116_vm3 = vmmov %vm2114_vm1 }
 0x10c   : > { %v598_v2 = vsel %vm2116_vm3, %v582_v60, 2147483647  ;;  %vm2117_vm4 = vmmov %vm2114_vm1 }
 0x10d   : > { %v599_v46 = vsel %vm2117_vm4, %v583_v61, 2147483647  ;;  %vm2118_vm5 = vmmov %vm2114_vm1 }
 0x10e   : > { %v600_v3 = vsel %vm2118_vm5, %v584_v0, 2147483647  ;;  %vm2119_vm6 = vmmov %vm2114_vm1 }
 0x10f   : > { %v603_v37 = vsel %vm2119_vm6, %v585_v11, 2147483647  ;;  %vm601_vm7 = vcmp.lt.s32.totalorder %v596_v1, %v600_v3  ;;  %vm2120_vm9 = vmmov %vm2114_vm1  ;;  %v1670_v17 = vpop.trf.xlu1 }
 0x110   : > { %vm604_vm8 = vcmp.lt.s32.totalorder %v597_v45, %v603_v37  ;;  %v606_v47 = vsel %vm2120_vm9, %v586_v13, 2147483647  ;;  %vm2121_vm10 = vmmov %vm2114_vm1  ;;  %v602_v62 = vsel %vm601_vm7, %v596_v1, %v600_v3  ;;  %v1271_v3 = vmov 0.0  }
 0x111   : > { %v609_v4 = vsel %vm2121_vm10, %v587_v24, 2147483647  ;;  %v605_v5 = vsel %vm604_vm8, %v597_v45, %v603_v37  ;;  %vm607_vm0 = vcmp.lt.s32.totalorder %v598_v2, %v606_v47  ;;  %vm2122_vm12 = vmmov %vm2114_vm1 }
 0x112   : > { %vm610_vm11 = vcmp.lt.s32.totalorder %v599_v46, %v609_v4  ;;  %v608_v6 = vsel %vm607_vm0, %v598_v2, %v606_v47  ;;  %v612_v8 = vsel %vm2122_vm12, %v588_v26, 2147483647  ;;  %vm2123_vm13 = vmmov %vm2114_vm1 }
 0x113   : > { %v611_v7 = vsel %vm610_vm11, %v599_v46, %v609_v4  ;;  %v615_v9 = vsel %vm2123_vm13, %v589_v19, 2147483647  ;;  %vm613_vm14 = vcmp.lt.s32.totalorder %v602_v62, %v612_v8  ;;  %vm2124_vm2 = vmmov %vm2114_vm1  ;;  %vm619_vm3 = vcmp.lt.s32.totalorder %v608_v6, %v618_v28 }
 0x114   : > { %vm616_vm15 = vcmp.lt.s32.totalorder %v605_v5, %v615_v9  ;;  %v621_v29 = vsel %vm2124_vm2, %v591_v23, 2147483647  ;;  %v614_v31 = vsel %vm613_vm14, %v602_v62, %v612_v8  ;;  %v620_v36 = vsel %vm619_vm3, %v608_v6, %v618_v28  ;;  %vm2125_vm5 = vmmov %vm2114_vm1 }
 0x115   : > { %v617_v33 = vsel %vm616_vm15, %v605_v5, %v615_v9  ;;  %vm622_vm4 = vcmp.lt.s32.totalorder %v611_v7, %v621_v29  ;;  %v624_v58 = vsel %vm2125_vm5, %v592_v39, 2147483647  ;;  %vm2126_vm6 = vmmov %vm2114_vm1  ;;  %v1270_v46 = vmov 1.0  }
 0x116   : > { %v623_v50 = vsel %vm622_vm4, %v611_v7, %v621_v29  ;;  %v627_v59 = vsel %vm2126_vm6, %v593_v32, 2147483647  ;;  %vm625_vm7 = vcmp.lt.s32.totalorder %v614_v31, %v624_v58  ;;  %vm2127_vm9 = vmmov %vm2114_vm1 }
 0x117   : > { %vm628_vm8 = vcmp.lt.s32.totalorder %v617_v33, %v627_v59  ;;  %v630_v60 = vsel %vm2127_vm9, %v594_v34, 2147483647  ;;  %vm2128_vm10 = vmmov %vm2114_vm1  ;;  %v626_v0 = vsel %vm625_vm7, %v614_v31, %v624_v58  ;;  %v1678_v10 = vpop.trf.xlu1 }
 0x118   : > { %v633_v61 = vsel %vm2128_vm10, %v595_v41, 2147483647  ;;  %v629_v11 = vsel %vm628_vm8, %v617_v33, %v627_v59  ;;  %vm631_vm0 = vcmp.lt.s32.totalorder %v620_v36, %v630_v60 }
 0x119   : > { %vm634_vm11 = vcmp.lt.s32.totalorder %v623_v50, %v633_v61  ;;  %v632_v13 = vsel %vm631_vm0, %v620_v36, %v630_v60  ;;  %vm636_vm12 = vcmp.lt.s32.totalorder %v626_v0, %v629_v11 }
 0x11a   : > { %v635_v24 = vsel %vm634_vm11, %v623_v50, %v633_v61  ;;  %v637_v26 = vsel %vm636_vm12, %v626_v0, %v629_v11  ;;  %vm2129_vm11 = vmmov %vm2126_vm6 }
 0x11b   : > { %vm638_vm13 = vcmp.lt.s32.totalorder %v632_v13, %v635_v24 }
 0x11c   : > { %v639_v19 = vsel %vm638_vm13, %v632_v13, %v635_v24 }
 0x11d   : > { %vm640_vm14 = vcmp.lt.s32.totalorder %v637_v26, %v639_v19 }
 0x11e   : > { %v641_v23 = vsel %vm640_vm14, %v637_v26, %v639_v19 }
 0x11f   : > { %v642_v39 = vrot.slane %v641_v23, 4  ;;  %v1680_v1 = vpop.trf.xlu1 }
 0x121   : > { %vm643_vm15 = vcmp.lt.s32.totalorder %v641_v23, %v642_v39 }
 0x122   : > { %v644_v32 = vsel %vm643_vm15, %v641_v23, %v642_v39 }
 0x123   : > { %v645_v34 = vrot.slane %v644_v32, 2 }
 0x125   : > { %vm646_vm1 = vcmp.lt.s32.totalorder %v644_v32, %v645_v34 }
 0x126   : > { %v647_v41 = vsel %vm646_vm1, %v644_v32, %v645_v34 }
 0x127   : > { %v648_v45 = vrot.slane %v647_v41, 1  ;;  %v1700_v47 = vpop.trf.xlu1 }
 0x129   : > { %vm649_vm2 = vcmp.lt.s32.totalorder %v647_v41, %v648_v45 }
 0x12a   : > { %v1682_v2 = vsel %vm649_vm2, %v647_v41, %v648_v45  ;;  %vm2130_vm2 = vmmov %vm2126_vm6 }
 0x12b   : > { %vm666_vm3 = vcmp.eq.s32.totalorder %v1592_v57, %v1682_v2  ;;  %vm651_vm4 = vcmp.eq.s32.totalorder %v1547_v30, %v1682_v2  ;;  %vm665_vm5 = vcmp.eq.s32.totalorder %v1589_v56, %v1682_v2  ;;  %vm664_vm7 = vcmp.eq.s32.totalorder %v1586_v55, %v1682_v2 }
 0x12c   : > { %1154 = vmatpush.msk.msra.mxu1 %vm666_vm3, %v1270_v46  ;;  %1191 = vmatpush.msk.msra.mxu3 %vm666_vm3, %v1270_v46  ;;  %v1138_v37 = vsel %vm651_vm4, 1.0, %v1271_v3  ;;  %vm654_vm8 = vcmp.eq.s32.totalorder %v1556_v40, %v1682_v2  ;;  %vm663_vm9 = vcmp.eq.s32.totalorder %v1583_v54, %v1682_v2  ;;  %vm662_vm10 = vcmp.eq.s32.totalorder %v1580_v53, %v1682_v2 }
 0x12d   : > { %v905_v4 = vsel %vm2126_vm6, %v1138_v37, 0.0  ;;  %v1141_v62 = vsel %vm654_vm8, 1.0, %v1271_v3  ;;  %vm661_vm0 = vcmp.eq.s32.totalorder %v1577_v52, %v1682_v2  ;;  %vm660_vm12 = vcmp.eq.s32.totalorder %v1574_v51, %v1682_v2 }
 0x12e   : > { %1155 = vmatpush.msk.msra.mxu1 %vm665_vm5, %v1270_v46  ;;  %1192 = vmatpush.msk.msra.mxu3 %vm665_vm5, %v1270_v46  ;;  %v914_v6 = vsel %vm2129_vm11, %v1141_v62, 0.0  ;;  %vm656_vm13 = vcmp.eq.s32.totalorder %v1562_v43, %v1682_v2  ;;  %vm659_vm14 = vcmp.eq.s32.totalorder %v1571_v49, %v1682_v2  ;;  %vm658_vm15 = vcmp.eq.s32.totalorder %v1568_v48, %v1682_v2 }
 0x12f   : > { %906 = vadd.xlane.f32.xlu0 %v905_v4  ;;  %v1749_v5 = vpop.trf.xlu1  ;;  %v1143_v7 = vsel %vm656_vm13, 1.0, %v1271_v3  ;;  %vm657_vm1 = vcmp.eq.s32.totalorder %v1565_v44, %v1682_v2  ;;  %vm655_vm6 = vcmp.eq.s32.totalorder %v1559_v42, %v1682_v2  ;;  %v1145_v8 = vsel %vm658_vm15, 1.0, %v1271_v3 }
 0x130   : > { %1156 = vmatpush.msk.msra.mxu1 %vm664_vm7, %v1270_v46  ;;  %1193 = vmatpush.msk.msra.mxu3 %vm664_vm7, %v1270_v46  ;;  %v920_v48 = vsel %vm2130_vm2, %v1143_v7, 0.0  ;;  %vm653_vm11 = vcmp.eq.s32.totalorder %v1553_v38, %v1682_v2  ;;  %v1147_v40 = vsel %vm660_vm12, 1.0, %v1271_v3  ;;  %v1149_v30 = vsel %vm662_vm10, 1.0, %v1271_v3 }
 0x131   : > { %v1151_v51 = vsel %vm664_vm7, 1.0, %v1271_v3  ;;  %v1153_v53 = vsel %vm666_vm3, 1.0, %v1271_v3  ;;  %vm283_vm7 = vcmask 7168   ;;  %vm2136_vm3 = vmmov %vm2130_vm2  ;;  %v1146_v38 = vsel %vm659_vm14, 1.0, %v1271_v3 }
 0x132   : > { %1157 = vmatpush.msk.msra.mxu1 %vm663_vm9, %v1270_v46  ;;  %1194 = vmatpush.msk.msra.mxu3 %vm663_vm9, %v1270_v46  ;;  %284 = vst.msk [vmem:[%s1874_s10] sm:$0xff] %vm283_vm7, %v1271_v3 }
 0x133   : > { %285 = vst.msk [vmem:[%s1874_s10 + $0x8] sm:$0xff] %vm283_vm7, %v1271_v3 }
 0x134   : > { %1158 = vmatpush.msk.msra.mxu1 %vm662_vm10, %v1270_v46  ;;  %1195 = vmatpush.msk.msra.mxu3 %vm662_vm10, %v1270_v46  ;;  %vm2135_vm10 = vmmov %vm2130_vm2  ;;  %286 = vst.msk [vmem:[%s1874_s10 + $0x10] sm:$0xff] %vm283_vm7, %v1271_v3 }
 0x135   : > { %v950_v50 = vsel %vm2135_vm10, %v1153_v53, 0.0  ;;  %287 = vst.msk [vmem:[%s1874_s10 + $0x18] sm:$0xff] %vm283_vm7, %v1271_v3  ;;  %vm2141_vm10 = vmmov %vm2130_vm2 }
 0x136   : > { %1159 = vmatpush.msk.msra.mxu1 %vm661_vm0, %v1270_v46  ;;  %1196 = vmatpush.msk.msra.mxu3 %vm661_vm0, %v1270_v46  ;;  %288 = vst.msk [vmem:[%s1874_s10 + $0x20] sm:$0xff] %vm283_vm7, %v1271_v3 }
 0x137   : > { %915 = vadd.xlane.f32.xlu0 %v914_v6  ;;  %v1789_v43 = vpop.trf.xlu1  ;;  %289 = vst.msk [vmem:[%s1874_s10 + $0x28] sm:$0xff] %vm283_vm7, %v1271_v3 }
 0x138   : > { %1160 = vmatpush.msk.msra.mxu1 %vm660_vm12, %v1270_v46  ;;  %1197 = vmatpush.msk.msra.mxu3 %vm660_vm12, %v1270_v46  ;;  %vm2134_vm12 = vmmov %vm2130_vm2  ;;  %290 = vst.msk [vmem:[%s1874_s10 + $0x30] sm:$0xff] %vm283_vm7, %v1271_v3 }
 0x139   : > { %291 = vst.msk [vmem:[%s1874_s10 + $0x38] sm:$0xff] %vm283_vm7, %v1271_v3  ;;  %v889_v61 = vld [vmem:[%s1874_s10] sm:$0xff] }
 0x13a   : > { %1161 = vmatpush.msk.msra.mxu1 %vm659_vm14, %v1270_v46  ;;  %1198 = vmatpush.msk.msra.mxu3 %vm659_vm14, %v1270_v46  ;;  %292 = vst.msk [vmem:[%s1874_s10 + $0x40] sm:$0xff] %vm283_vm7, %v1271_v3 }
 0x13b   : > { %293 = vst.msk [vmem:[%s1874_s10 + $0x48] sm:$0xff] %vm283_vm7, %v1271_v3 }
 0x13c   : > { %1162 = vmatpush.msk.msra.mxu1 %vm658_vm15, %v1270_v46  ;;  %1199 = vmatpush.msk.msra.mxu3 %vm658_vm15, %v1270_v46  ;;  %vm2132_vm15 = vmmov %vm2130_vm2  ;;  %294 = vst.msk [vmem:[%s1874_s10 + $0x50] sm:$0xff] %vm283_vm7, %v1271_v3  ;;  %v892_v13 = vld [vmem:[%s1874_s10 + $0x18] sm:$0xff] }
 0x13d   : > { %v932_v31 = vsel %vm2132_vm15, %v1147_v40, 0.0  ;;  %295 = vst.msk [vmem:[%s1874_s10 + $0x58] sm:$0xff] %vm283_vm7, %v1271_v3  ;;  %vm2138_vm15 = vmmov %vm2130_vm2 }
 0x13e   : > { %1163 = vmatpush.msk.msra.mxu1 %vm657_vm1, %v1270_v46  ;;  %1200 = vmatpush.msk.msra.mxu3 %vm657_vm1, %v1270_v46  ;;  %296 = vst.msk [vmem:[%s1874_s10 + $0x60] sm:$0xff] %vm283_vm7, %v1271_v3  ;;  %v894_v19 = vld [vmem:[%s1874_s10 + $0x28] sm:$0xff] }
 0x13f   : > { %921 = vadd.xlane.f32.xlu0 %v920_v48  ;;  %v722_v9 = vpop.trf.xlu1  ;;  %297 = vst.msk [vmem:[%s1874_s10 + $0x68] sm:$0xff] %vm283_vm7, %v1271_v3 }
 0x140   : > { %1164 = vmatpush.msk.msra.mxu1 %vm656_vm13, %v1270_v46  ;;  %1201 = vmatpush.msk.msra.mxu3 %vm656_vm13, %v1270_v46  ;;  %vm2131_vm13 = vmmov %vm2130_vm2  ;;  %298 = vst.msk [vmem:[%s1874_s10 + $0x70] sm:$0xff] %vm283_vm7, %v1271_v3  ;;  %v896_v39 = vld [vmem:[%s1874_s10 + $0x38] sm:$0xff] }
 0x141   : > { %v926_v28 = vsel %vm2131_vm13, %v1145_v8, 0.0  ;;  %299 = vst.msk [vmem:[%s1874_s10 + $0x78] sm:$0xff] %vm283_vm7, %v1271_v3  ;;  %vm2137_vm13 = vmmov %vm2130_vm2 }
 0x142   : > { %1165 = vmatpush.msk.msra.mxu1 %vm655_vm6, %v1270_v46  ;;  %1202 = vmatpush.msk.msra.mxu3 %vm655_vm6, %v1270_v46 }
 0x144   : > { %1166 = vmatpush.msk.msra.mxu1 %vm654_vm8, %v1270_v46  ;;  %1203 = vmatpush.msk.msra.mxu3 %vm654_vm8, %v1270_v46  ;;  %vm652_vm8 = vcmp.eq.s32.totalorder %v1550_v35, %v1682_v2  ;;  %v900_v37 = vld [vmem:[%s1874_s10 + $0x58] sm:$0xff]  ;;  %v1144_v35 = vsel %vm657_vm1, 1.0, %v1271_v3  ;;  %vm2169_vm1 = vmmov %vm2130_vm2  ;;  %v891_v2 = vld [vmem:[%s1874_s10 + $0x10] sm:$0xff] }
 0x145   : > { %vm2170_vm14 = vmmov %vm2169_vm1 }
 0x146   : > { %1167 = vmatpush.msk.msra.mxu1 %vm653_vm11, %v1270_v46  ;;  %1204 = vmatpush.msk.msra.mxu3 %vm653_vm11, %v1270_v46 }
 0x147   : > { %927 = vadd.xlane.f32.xlu0 %v926_v28  ;;  %v723_v29 = vpop.trf.xlu1 }
 0x148   : > { %1168 = vmatpush.msk.msra.mxu1 %vm652_vm8, %v1270_v46  ;;  %1205 = vmatpush.msk.msra.mxu3 %vm652_vm8, %v1270_v46  ;;  %v904_v8 = vld [vmem:[%s1874_s10 + $0x78] sm:$0xff] }
 0x14a   : > { %1169 = vmatpush.msk.msra.mxu1 %vm651_vm4, %v1270_v46  ;;  %1206 = vmatpush.msk.msra.mxu3 %vm651_vm4, %v1270_v46  ;;  %vm2133_vm4 = vmmov %vm2130_vm2 }
 0x14b   : > { %747 = vmatmul.f32.vlgmr.msra.gmra.mxu1 %v1622_v63  ;;  %771 = vmatmul.f32.vlgmr.msra.gmra.mxu3 %v723_v29  ;;  %v938_v63 = vsel %vm2133_vm4, %v1149_v30, 0.0  ;;  %vm2139_vm4 = vmmov %vm2130_vm2 }
 0x14f   : > { %933 = vadd.xlane.f32.xlu0 %v932_v31  ;;  %v724_v33 = vpop.trf.xlu1 }
 0x153   : > { %750 = vmatmul.f32.gmra.mxu1 %v1670_v17  ;;  %774 = vmatmul.f32.gmra.mxu3 %v724_v33  ;;  %v944_v17 = vsel %vm2134_vm12, %v1151_v51, 0.0  ;;  %vm2140_vm12 = vmmov %vm2130_vm2 }
 0x157   : > { %939 = vadd.xlane.f32.xlu0 %v938_v63  ;;  %v725_v36 = vpop.trf.xlu1 }
 0x15b   : > { %753 = vmatmul.f32.gmra.mxu1 %v1678_v10  ;;  %777 = vmatmul.f32.gmra.mxu3 %v725_v36 }
 0x15f   : > { %945 = vadd.xlane.f32.xlu0 %v944_v17  ;;  %v726_v55 = vpop.trf.xlu1 }
 0x163   : > { %756 = vmatmul.f32.gmra.mxu1 %v1680_v1  ;;  %780 = vmatmul.f32.gmra.mxu3 %v726_v55  ;;  %v898_v1 = vld [vmem:[%s1874_s10 + $0x48] sm:$0xff] }
 0x167   : > { %951 = vadd.xlane.f32.xlu0 %v950_v50  ;;  %v727_v57 = vpop.trf.xlu1 }
 0x16b   : > { %759 = vmatmul.f32.gmra.mxu1 %v1700_v47  ;;  %783 = vmatmul.f32.gmra.mxu3 %v727_v57 }
 0x16f   : > { %v728_v58 = vpop.trf.xlu1 }
 0x173   : > { %762 = vmatmul.f32.gmra.mxu1 %v1749_v5  ;;  %786 = vmatmul.f32.gmra.mxu3 %v728_v58  ;;  %v902_v5 = vld [vmem:[%s1874_s10 + $0x68] sm:$0xff] }
 0x177   : > { %v729_v59 = vpop.trf.xlu1 }
 0x17b   : > { %765 = vmatmul.f32.gmra.mxu1 %v1789_v43  ;;  %789 = vmatmul.f32.gmra.mxu3 %v729_v59 }
 0x17f   : > { %v730_v60 = vpop.trf.xlu1 }
 0x183   : > { %768 = vmatmul.f32.gmra.mxu1 %v722_v9  ;;  %792 = vmatmul.f32.gmra.mxu3 %v730_v60 }
 0x1a2   : > { %v907_v0 = vpop.xlane.xlu0 %906 }
 0x1a3   : > { %v953_v11 = vadd.f32 %v907_v0, %v889_v61 }
 0x1a5   : > { %970 = vst.msk [vmem:[%s1874_s10] sm:$0xff] %vm283_vm7, %v953_v11 }
 0x1aa   : > { %v916_v24 = vpop.xlane.xlu0 %915 }
 0x1ab   : > { %v956_v26 = vadd.f32 %v916_v24, %v892_v13 }
 0x1ad   : > { %973 = vst.msk [vmem:[%s1874_s10 + $0x18] sm:$0xff] %vm283_vm7, %v956_v26 }
 0x1b2   : > { %v922_v10 = vpop.xlane.xlu0 %921 }
 0x1b3   : > { %v958_v23 = vadd.f32 %v922_v10, %v894_v19 }
 0x1b5   : > { %975 = vst.msk [vmem:[%s1874_s10 + $0x28] sm:$0xff] %vm283_vm7, %v958_v23 }
 0x1ba   : > { %v928_v32 = vpop.xlane.xlu0 %927 }
 0x1bb   : > { %v960_v34 = vadd.f32 %v928_v32, %v896_v39 }
 0x1bd   : > { %977 = vst.msk [vmem:[%s1874_s10 + $0x38] sm:$0xff] %vm283_vm7, %v960_v34 }
 0x1c2   : > { %v934_v41 = vpop.xlane.xlu0 %933 }
 0x1c3   : > { %v962_v45 = vadd.f32 %v934_v41, %v898_v1 }
 0x1c5   : > { %979 = vst.msk [vmem:[%s1874_s10 + $0x48] sm:$0xff] %vm283_vm7, %v962_v45 }
 0x1c8   : > { %v748_v46 = vpop.f32.mrf.mxu1 }
 0x1c9   : > { %796 = vst.msk [vmem:[%s1952_s13] sm:$0xff] %vm2136_vm3, %v748_v46  ;;  %vm2142_vm3 = vmmov %vm2130_vm2  ;;  %v812_v17 = vsub.f32 %v748_v46, %v1414_v27 }
 0x1ca   : > { %v940_v47 = vpop.xlane.xlu0 %939 }
 0x1cb   : > { %v964_v4 = vadd.f32 %v940_v47, %v900_v37  ;;  %v829_v57 = vmul.f32 %v812_v17, %v812_v17 }
 0x1cd   : > { %981 = vst.msk [vmem:[%s1874_s10 + $0x58] sm:$0xff] %vm283_vm7, %v964_v4 }
 0x1ce   : > { %v772_v6 = vpop.f32.mrf.mxu3 }
 0x1cf   : > { %804 = vst.msk [vmem:[%s1952_s13 + $0x40] sm:$0xff] %vm2137_vm13, %v772_v6  ;;  %vm2143_vm13 = vmmov %vm2130_vm2  ;;  %v820_v39 = vsub.f32 %v772_v6, %v1359_v14  ;;  %v1239_v14 = vld [vmem:[%s1335_s29 + $0x50] sm:$0xff] }
 0x1d0   : > { %v751_v62 = vpop.f32.mrf.mxu1 }
 0x1d1   : > { %797 = vst.msk [vmem:[%s1952_s13 + $0x8] sm:$0xff] %vm2130_vm2, %v751_v62  ;;  %v813_v63 = vsub.f32 %v751_v62, %v1406_v25  ;;  %v837_v47 = vmul.f32 %v820_v39, %v820_v39  ;;  %v1142_v39 = vsel %vm655_vm6, 1.0, %v1271_v3  ;;  %vm2168_vm6 = vmmov %vm2130_vm2 }
 0x1d2   : > { %v946_v7 = vpop.xlane.xlu0 %945 }
 0x1d3   : > { %v966_v43 = vadd.f32 %v946_v7, %v902_v5  ;;  %v830_v55 = vmul.f32 %v813_v63, %v813_v63  ;;  %v1240_v7 = vld [vmem:[%s1335_s29 + $0x58] sm:$0xff]  ;;  %v1242_v63 = vld [vmem:[%s1335_s29 + $0x68] sm:$0xff] }
 0x1d5   : > { %983 = vst.msk [vmem:[%s1874_s10 + $0x68] sm:$0xff] %vm283_vm7, %v966_v43 }
 0x1d6   : > { %v775_v9 = vpop.f32.mrf.mxu3 }
 0x1d7   : > { %805 = vst.msk [vmem:[%s1952_s13 + $0x48] sm:$0xff] %vm2139_vm4, %v775_v9  ;;  %vm2145_vm4 = vmmov %vm2130_vm2  ;;  %v821_v41 = vsub.f32 %v775_v9, %v1353_v12  ;;  %v1241_v9 = vld [vmem:[%s1335_s29 + $0x60] sm:$0xff] }
 0x1d8   : > { %v754_v48 = vpop.f32.mrf.mxu1  ;;  %v846_v25 = vsel %vm2145_vm4, %v830_v55, 0.0  ;;  %vm2151_vm4 = vmmov %vm2130_vm2  ;;  %v1243_v55 = vld [vmem:[%s1335_s29 + $0x70] sm:$0xff] }
 0x1d9   : > { %798 = vst.msk [vmem:[%s1952_s13 + $0x10] sm:$0xff] %vm2138_vm15, %v754_v48  ;;  %v814_v53 = vsub.f32 %v754_v48, %v1395_v22  ;;  %vm2144_vm15 = vmmov %vm2130_vm2  ;;  %v838_v6 = vmul.f32 %v821_v41, %v821_v41  ;;  %v1152_v41 = vsel %vm665_vm5, 1.0, %v1271_v3  ;;  %vm281_vm5 = vcmask 0  }
 0x1da   : > { %v952_v28 = vpop.xlane.xlu0 %951  ;;  %v947_v52 = vsel %vm2170_vm14, %v1152_v41, 0.0  ;;  %282 = vst.msk [vmem:[%s271_s14] sm:$0x1] %vm281_vm5, %v1271_v3 }
 0x1db   : > { %v968_v40 = vadd.f32 %v952_v28, %v904_v8  ;;  %v831_v58 = vmul.f32 %v814_v53, %v814_v53 }
 0x1dd   : > { %985 = vst.msk [vmem:[%s1874_s10 + $0x78] sm:$0xff] %vm283_vm7, %v968_v40 }
 0x1de   : > { %v778_v31 = vpop.f32.mrf.mxu3 }
 0x1df   : > { %806 = vst.msk [vmem:[%s1952_s13 + $0x50] sm:$0xff] %vm2141_vm10, %v778_v31  ;;  %vm2147_vm10 = vmmov %vm2130_vm2  ;;  %v822_v4 = vsub.f32 %v778_v31, %v1239_v14 }
 0x1e0   : > { %v757_v29 = vpop.f32.mrf.mxu1  ;;  %v848_v11 = vsel %vm2147_vm10, %v831_v58, 0.0  ;;  %vm2153_vm10 = vmmov %vm2130_vm2 }
 0x1e1   : > { %799 = vst.msk [vmem:[%s1952_s13 + $0x18] sm:$0xff] %vm2140_vm12, %v757_v29  ;;  %v815_v50 = vsub.f32 %v757_v29, %v1390_v21  ;;  %vm2146_vm12 = vmmov %vm2130_vm2 }
 0x1e2   : > { %v845_v0 = vsel %vm2146_vm12, %v829_v57, 0.0  ;;  %vm2152_vm12 = vmmov %vm2130_vm2  ;;  %v1244_v57 = vld [vmem:[%s1335_s29 + $0x78] sm:$0xff] }
 0x1e3   : > { %v832_v60 = vmul.f32 %v815_v50, %v815_v50  ;;  %v847_v24 = vadd.f32 %v846_v25, %v845_v0 }
 0x1e6   : > { %v781_v33 = vpop.f32.mrf.mxu3 }
 0x1e7   : > { %807 = vst.msk [vmem:[%s1952_s13 + $0x58] sm:$0xff] %vm2130_vm2, %v781_v33  ;;  %v823_v12 = vsub.f32 %v781_v33, %v1240_v7 }
 0x1e8   : > { %v760_v30 = vpop.f32.mrf.mxu1 }
 0x1e9   : > { %800 = vst.msk [vmem:[%s1952_s13 + $0x20] sm:$0xff] %vm2142_vm3, %v760_v30  ;;  %v816_v59 = vsub.f32 %v760_v30, %v1385_v20  ;;  %vm2148_vm3 = vmmov %vm2130_vm2  ;;  %v840_v30 = vmul.f32 %v823_v12, %v823_v12  ;;  %v893_v12 = vld [vmem:[%s1874_s10 + $0x20] sm:$0xff] }
 0x1eb   : > { %v833_v13 = vmul.f32 %v816_v59, %v816_v59 }
 0x1ee   : > { %v784_v36 = vpop.f32.mrf.mxu3 }
 0x1ef   : > { %808 = vst.msk [vmem:[%s1952_s13 + $0x60] sm:$0xff] %vm2144_vm15, %v784_v36  ;;  %vm2150_vm15 = vmmov %vm2130_vm2  ;;  %v824_v28 = vsub.f32 %v784_v36, %v1241_v9 }
 0x1f0   : > { %v763_v51 = vpop.f32.mrf.mxu1  ;;  %v852_v19 = vsel %vm2150_vm15, %v833_v13, 0.0  ;;  %vm2156_vm15 = vmmov %vm2130_vm2 }
 0x1f1   : > { %801 = vst.msk [vmem:[%s1952_s13 + $0x28] sm:$0xff] %vm2143_vm13, %v763_v51  ;;  %v817_v27 = vsub.f32 %v763_v51, %v1377_v18  ;;  %vm2149_vm13 = vmmov %vm2130_vm2  ;;  %v849_v18 = vadd.f32 %v848_v11, %v847_v24  ;;  %v862_v31 = vsel %vm2156_vm15, %v838_v6, 0.0  ;;  %v841_v53 = vmul.f32 %v824_v28, %v824_v28  ;;  %v897_v28 = vld [vmem:[%s1874_s10 + $0x40] sm:$0xff] }
 0x1f2   : > { %v850_v20 = vsel %vm2149_vm13, %v832_v60, 0.0  ;;  %vm2155_vm13 = vmmov %vm2130_vm2 }
 0x1f3   : > { %v834_v26 = vmul.f32 %v817_v27, %v817_v27  ;;  %v851_v23 = vadd.f32 %v850_v20, %v849_v18  ;;  %v860_v8 = vsel %vm2155_vm13, %v837_v47, 0.0  ;;  %vm2161_vm13 = vmmov %vm2130_vm2  ;;  %v1139_v18 = vsel %vm652_vm8, 1.0, %v1271_v3  ;;  %v890_v47 = vld [vmem:[%s1874_s10 + $0x8] sm:$0xff] }
 0x1f4   : > { %vm2162_vm15 = vmmov %vm2130_vm2 }
 0x1f5   : > { %v854_v32 = vsel %vm2151_vm4, %v834_v26, 0.0  ;;  %vm2157_vm4 = vmmov %vm2130_vm2 }
 0x1f6   : > { %v787_v22 = vpop.f32.mrf.mxu3  ;;  %vm2166_vm8 = vmmov %vm2130_vm2 }
 0x1f7   : > { %809 = vst.msk [vmem:[%s1952_s13 + $0x68] sm:$0xff] %vm2130_vm2, %v787_v22  ;;  %v825_v51 = vsub.f32 %v787_v22, %v1242_v63 }
 0x1f8   : > { %v766_v61 = vpop.f32.mrf.mxu1 }
 0x1f9   : > { %802 = vst.msk [vmem:[%s1952_s13 + $0x30] sm:$0xff] %vm2148_vm3, %v766_v61  ;;  %v818_v21 = vsub.f32 %v766_v61, %v1369_v16  ;;  %v853_v16 = vadd.f32 %v852_v19, %v851_v23  ;;  %vm2154_vm3 = vmmov %vm2130_vm2  ;;  %v842_v25 = vmul.f32 %v825_v51, %v825_v51  ;;  %v901_v51 = vld [vmem:[%s1874_s10 + $0x60] sm:$0xff] }
 0x1fb   : > { %v835_v10 = vmul.f32 %v818_v21, %v818_v21  ;;  %v855_v37 = vadd.f32 %v854_v32, %v853_v16  ;;  %v870_v11 = vsel %vm2130_vm2, %v842_v25, 0.0  ;;  %v923_v16 = vsel %vm2166_vm8, %v1144_v35, 0.0 }
 0x1fd   : > { %v856_v45 = vsel %vm2152_vm12, %v835_v10, 0.0  ;;  %vm2158_vm12 = vmmov %vm2130_vm2  ;;  %v1140_v10 = vsel %vm653_vm11, 1.0, %v1271_v3 }
 0x1fe   : > { %v790_v1 = vpop.f32.mrf.mxu3  ;;  %v857_v5 = vadd.f32 %v856_v45, %v855_v37  ;;  %vm2167_vm11 = vmmov %vm2130_vm2 }
 0x1ff   : > { %810 = vst.msk [vmem:[%s1952_s13 + $0x70] sm:$0xff] %vm2154_vm3, %v790_v1  ;;  %v826_v50 = vsub.f32 %v790_v1, %v1243_v55  ;;  %vm2160_vm3 = vmmov %vm2130_vm2  ;;  %v929_v42 = vsel %vm2167_vm11, %v1146_v38, 0.0  ;;  %v1150_v1 = vsel %vm663_vm9, 1.0, %v1271_v3 }
 0x200   : > { %v769_v34 = vpop.f32.mrf.mxu1  ;;  %v868_v27 = vsel %vm2160_vm3, %v841_v53, 0.0  ;;  %v941_v49 = vsel %vm2169_vm1, %v1150_v1, 0.0  ;;  %v903_v53 = vld [vmem:[%s1874_s10 + $0x70] sm:$0xff] }
 0x201   : > { %803 = vst.msk [vmem:[%s1952_s13 + $0x38] sm:$0xff] %vm2153_vm10, %v769_v34  ;;  %v819_v46 = vsub.f32 %v769_v34, %v1364_v15  ;;  %v839_v15 = vmul.f32 %v822_v4, %v822_v4  ;;  %vm2159_vm10 = vmmov %vm2130_vm2  ;;  %v843_v61 = vmul.f32 %v826_v50, %v826_v50  ;;  %v1148_v34 = vsel %vm661_vm0, 1.0, %v1271_v3 }
 0x202   : > { %v866_v36 = vsel %vm2159_vm10, %v840_v30, 0.0  ;;  %vm2165_vm10 = vmmov %vm2130_vm2  ;;  %v935_v44 = vsel %vm2168_vm6, %v1148_v34, 0.0 }
 0x203   : > { %v836_v62 = vmul.f32 %v819_v46, %v819_v46  ;;  %v864_v17 = vsel %vm2158_vm12, %v839_v15, 0.0  ;;  %v872_v21 = vsel %vm2161_vm13, %v843_v61, 0.0  ;;  %vm2164_vm12 = vmmov %vm2130_vm2  ;;  %v917_v32 = vsel %vm2165_vm10, %v1142_v39, 0.0 }
 0x204   : > { %v911_v23 = vsel %vm2164_vm12, %v1140_v10, 0.0 }
 0x205   : > { %v858_v43 = vsel %vm2130_vm2, %v836_v62, 0.0 }
 0x206   : > { %v859_v48 = vadd.f32 %v858_v43, %v857_v5  ;;  %v793_v29 = vpop.f32.mrf.mxu3 }
 0x207   : > { %811 = vst.msk [vmem:[%s1952_s13 + $0x78] sm:$0xff] %vm2157_vm4, %v793_v29  ;;  %v827_v58 = vsub.f32 %v793_v29, %v1244_v57  ;;  %vm2163_vm4 = vmmov %vm2130_vm2 }
 0x208   : > { %v861_v40 = vadd.f32 %v860_v8, %v859_v48  ;;  %v908_v19 = vsel %vm2163_vm4, %v1139_v18, 0.0  ;;  %v895_v8 = vld [vmem:[%s1874_s10 + $0x30] sm:$0xff] }
 0x209   : > { %v844_v0 = vmul.f32 %v827_v58, %v827_v58 }
 0x20a   : > { %v863_v33 = vadd.f32 %v862_v31, %v861_v40  ;;  %v899_v31 = vld [vmem:[%s1874_s10 + $0x50] sm:$0xff] }
 0x20b   : > { %v874_v24 = vsel %vm2162_vm15, %v844_v0, 0.0 }
 0x20c   : > { %v865_v59 = vadd.f32 %v864_v17, %v863_v33  ;;  %v828_v17 = vld [vmem:[%s271_s14] sm:$0x1] }
 0x20e   : > { %v867_v60 = vadd.f32 %v866_v36, %v865_v59 }
 0x210   : > { %v869_v22 = vadd.f32 %v868_v27, %v867_v60 }
 0x212   : > { %v871_v13 = vadd.f32 %v870_v11, %v869_v22 }
 0x214   : > { %v873_v20 = vadd.f32 %v872_v21, %v871_v13 }
 0x216   : > { %v875_v26 = vadd.f32 %v874_v24, %v873_v20 }
 0x218   : > { %876 = vadd.xlane.f32.xlu2 %v875_v26 }
 0x220   : > { %909 = vadd.xlane.f32.xlu2 %v908_v19 }
 0x228   : > { %912 = vadd.xlane.f32.xlu2 %v911_v23 }
 0x230   : > { %918 = vadd.xlane.f32.xlu2 %v917_v32 }
 0x238   : > { %924 = vadd.xlane.f32.xlu2 %v923_v16 }
 0x240   : > { %930 = vadd.xlane.f32.xlu2 %v929_v42 }
 0x248   : > { %936 = vadd.xlane.f32.xlu2 %v935_v44 }
 0x250   : > { %942 = vadd.xlane.f32.xlu2 %v941_v49 }
 0x258   : > { %948 = vadd.xlane.f32.xlu2 %v947_v52 }
 0x28b   : > { %v877_v45 = vpop.xlane.xlu2 %876 }
 0x28c   : > { %v878_v46 = vrot.slane %v877_v45, 4 }
 0x28e   : > { %v879_v37 = vadd.f32 %v878_v46, %v877_v45 }
 0x290   : > { %v880_v54 = vrot.slane %v879_v37, 2 }
 0x292   : > { %v881_v14 = vadd.f32 %v880_v54, %v879_v37 }
 0x293   : > { %v910_v4 = vpop.xlane.xlu2 %909 }
 0x294   : > { %v954_v62 = vadd.f32 %v910_v4, %v890_v47  ;;  %v882_v5 = vrot.slane %v881_v14, 1 }
 0x296   : > { %971 = vst.msk [vmem:[%s1874_s10 + $0x8] sm:$0xff] %vm283_vm7, %v954_v62  ;;  %v883_v56 = vadd.f32 %v882_v5, %v881_v14 }
 0x298   : > { %1207 = vpush %v883_v56 }
 0x29b   : > { %v913_v6 = vpop.xlane.xlu2 %912 }
 0x29c   : > { %v955_v7 = vadd.f32 %v913_v6, %v891_v2 }
 0x29e   : > { %972 = vst.msk [vmem:[%s1874_s10 + $0x10] sm:$0xff] %vm283_vm7, %v955_v7 }
 0x2a3   : > { %v919_v43 = vpop.xlane.xlu2 %918 }
 0x2a4   : > { %v957_v48 = vadd.f32 %v919_v43, %v893_v12 }
 0x2a6   : > { %974 = vst.msk [vmem:[%s1874_s10 + $0x20] sm:$0xff] %vm283_vm7, %v957_v48 }
 0x2ab   : > { %v925_v15 = vpop.xlane.xlu2 %924 }
 0x2ac   : > { %v959_v9 = vadd.f32 %v925_v15, %v895_v8 }
 0x2ae   : > { %976 = vst.msk [vmem:[%s1874_s10 + $0x30] sm:$0xff] %vm283_vm7, %v959_v9 }
 0x2b3   : > { %v931_v40 = vpop.xlane.xlu2 %930 }
 0x2b4   : > { %v961_v29 = vadd.f32 %v931_v40, %v897_v28 }
 0x2b6   : > { %978 = vst.msk [vmem:[%s1874_s10 + $0x40] sm:$0xff] %vm283_vm7, %v961_v29 }
 0x2bb   : > { %v937_v30 = vpop.xlane.xlu2 %936 }
 0x2bc   : > { %v963_v63 = vadd.f32 %v937_v30, %v899_v31 }
 0x2be   : > { %980 = vst.msk [vmem:[%s1874_s10 + $0x50] sm:$0xff] %vm283_vm7, %v963_v63 }
 0x2c3   : > { %v943_v3 = vpop.xlane.xlu2 %942 }
 0x2c4   : > { %v965_v33 = vadd.f32 %v943_v3, %v901_v51 }
 0x2c6   : > { %982 = vst.msk [vmem:[%s1874_s10 + $0x60] sm:$0xff] %vm283_vm7, %v965_v33 }
 0x2c9   : > { %s1208_s18 = spop %1207 }
 0x2ca   : > { %v885_v55 = vstv %s1208_s18 }
 0x2cb   : > { %v886_v50 = vadd.f32 %v885_v55, %v828_v17  ;;  %v949_v57 = vpop.xlane.xlu2 %948 }
 0x2cc   : > { %v967_v58 = vadd.f32 %v949_v57, %v903_v53 }
 0x2cd   : > { %888 = vst.msk [vmem:[%s271_s14] sm:$0x1] %vm281_vm5, %v886_v50 }
 0x2ce   : > { %984 = vst.msk [vmem:[%s1874_s10 + $0x70] sm:$0xff] %vm283_vm7, %v967_v58 }
 0x2cf PF: > { %s16_s20 = sadd.s32 1, %s1267_s20   ;;  %s2171_s18 = smov %s1263_s19 }
 0x2d0   : > { %p13_p5 = scmp.ge.s32.totalorder %s16_s20, 4   ;;  %s2172_s19 = smov %s2174_s21 }
 0x2d2   :  { %15 = sbr.rel (!%p13_p5) target bundleno = 2 (0x2), region = 90 }

</bundles_post_ra>
